<compile_context>
chip_gen: v7x
topology: tpu7x:2x2x1
jax: 0.10.0
libtpu: 0.0.40
codegen_flags: <defaults>
</compile_context>

<pallas_src>
import functools
import math
import numpy as np
import jax
import jax.numpy as jnp
from jax import lax
from jax.experimental import pallas as pl
from jax.experimental.pallas import tpu as pltpu


def _mllt_kernel(ot_ref, wc_ref, bc_ref, out_ref, *, bt, nt, e):
    # ot_ref : (Bt, Nt, E) f32   batch block of encoder hidden states
    # wc_ref : (E, L)      bf16  fused projection  (1/sqrt(E)) * W @ cf^T
    # bc_ref : (1, L)      f32   fused bias        b @ cf^T
    # out_ref: (Bt, E)     f32
    ot = ot_ref[...]                                               # (Bt, Nt, E) f32

    # g = fc(Ot/sqrt(E)) @ fc(c)^T, fused to a single (Bt*Nt, E) @ (E, L) matmul.
    ot2d = ot.reshape(bt * nt, e).astype(jnp.bfloat16)
    g = jnp.dot(ot2d, wc_ref[...],
                preferred_element_type=jnp.float32) + bc_ref[...]  # (Bt*Nt, L)

    # m = max_pool over labels; softmax over the Nt token axis per batch row.
    m = jnp.max(g, axis=-1, keepdims=True).reshape(bt, nt, 1)      # (Bt, Nt, 1)
    m_max = jnp.max(m, axis=1, keepdims=True)                      # (Bt, 1, 1)
    ex = jnp.exp(m - m_max)
    # Fold the trailing mean's 1/Nt into the softmax denominator.
    denom = jnp.sum(ex, axis=1, keepdims=True) * float(nt)         # (Bt, 1, 1)
    att = ex * pl.reciprocal(denom, approx=True)                   # (Bt, Nt, 1)

    # Ot_E_batch = dropout(Ot * att).mean(1)   (dropout == identity in eval).
    out_ref[...] = jnp.sum(ot * att, axis=1).astype(out_ref.dtype)  # (Bt, E)


def _choose_bt(B, Nt, E):
    # Target ~512 MXU rows per grid step, capped by a ~8 MiB per-buffer VMEM
    # budget for the f32 input block (double-buffered by the pipeline).
    vmem_bt = max(1, (8 * 1024 * 1024) // (Nt * E * 4))
    tgt_bt = max(1, -(-512 // Nt))                 # cdiv(512, Nt)
    bt = min(vmem_bt, tgt_bt)
    if bt >= B:
        return B                                   # single step, full-batch block
    # Keep bt a multiple of 8 so the (bt, E) output block is sublane-dense.
    return max(8, (bt // 8) * 8)


def mllt_forward(ot_h, label_h, fc_w_t, fc_b):
    """ot_h: (B, Nt, E) f32; label_h: (L, Nl, E) f32;
       fc_w_t: (E, F) f32 (pre-transposed nn.Linear weight); fc_b: (F,) f32
       ->  (B, E) f32"""
    B, Nt, E = ot_h.shape
    L, Nl, _ = label_h.shape
    F = fc_w_t.shape[1]
    hp = jax.lax.Precision.HIGHEST

    # Hoisted label pathway + matmul fusion (computed once, f32):
    #   c  = encoder(label).last_hidden_state.mean(1)    -> (L, E)
    #   cf = fc(c)                                        -> (L, F)
    #   wc = (1/sqrt(E)) * W @ cf^T                       -> (E, L)
    #   bc = b @ cf^T                                     -> (1, L)
    c = jnp.mean(label_h, axis=1)                                        # (L, E)
    cf = jnp.dot(c, fc_w_t, precision=hp) + fc_b                         # (L, F)
    scale = 1.0 / math.sqrt(float(E))
    wc = (scale * jnp.dot(fc_w_t, cf.T, precision=hp)).astype(jnp.bfloat16)   # (E, L)
    bc = jnp.dot(fc_b.reshape(1, F), cf.T, precision=hp).astype(jnp.float32)  # (1, L)

    bt = _choose_bt(B, Nt, E)
    Bp = pl.cdiv(B, bt) * bt
    if Bp != B:
        # Zero-padded rows produce zero outputs (uniform softmax * zero inputs).
        ot_h = jnp.pad(ot_h, ((0, Bp - B), (0, 0), (0, 0)))

    kernel = functools.partial(_mllt_kernel, bt=bt, nt=Nt, e=E)

    out = pl.pallas_call(
        kernel,
        out_shape=jax.ShapeDtypeStruct((Bp, E), jnp.float32),
        grid_spec=pltpu.PrefetchScalarGridSpec(
            num_scalar_prefetch=0,
            grid=(Bp // bt,),
            in_specs=[
                pl.BlockSpec((bt, Nt, E), lambda i: (i, 0, 0)),   # streamed batch block
                pl.BlockSpec((E, L), lambda i: (0, 0)),           # fused weight (bf16)
                pl.BlockSpec((1, L), lambda i: (0, 0)),           # fused bias (f32)
            ],
            out_specs=pl.BlockSpec((bt, E), lambda i: (i, 0)),
        ),
        compiler_params=pltpu.CompilerParams(
            dimension_semantics=("parallel",),
        ),
    )(ot_h, wc, bc)
    return out[:B]


def mllt_reference(ot_h, label_h, fc_w_t, fc_b):
    """Pure-JAX f32 reference mirroring the PyTorch forward (eval mode)."""
    B, Nt, E = ot_h.shape
    hp = jax.lax.Precision.HIGHEST
    c = jnp.mean(label_h, axis=1)                                           # (L, E)
    v = jnp.einsum("bte,ef->btf", ot_h / math.sqrt(E), fc_w_t, precision=hp) + fc_b
    cf = jnp.einsum("le,ef->lf", c, fc_w_t, precision=hp) + fc_b
    g = jnp.einsum("btf,lf->btl", v, cf, precision=hp)                      # (B, Nt, L)
    m = jnp.max(g, axis=-1, keepdims=True)                                  # (B, Nt, 1)
    att = jax.nn.softmax(m, axis=1)                                         # (B, Nt, 1)
    return jnp.mean(ot_h * att, axis=1)                                     # (B, E)


if __name__ == "__main__":
    # Small shapes consistent with the module (hidden_size=768, fc: 768->384).
    B, Nt = 2, 16          # batch of clinical notes, tokens per note
    L, Nl = 8, 8           # number of labels, tokens per label
    E, Fdim = 768, 384     # BART hidden size, fc output size

    key = jax.random.PRNGKey(0)
    k_ot, k_lab, k_w, k_b = jax.random.split(key, 4)

    ot_h = jax.random.normal(k_ot, (B, Nt, E), dtype=jnp.float32)
    label_h = jax.random.normal(k_lab, (L, Nl, E), dtype=jnp.float32)
    # nn.Linear(768, 384): weight (384, 768), bias (384,). Store weight pre-transposed.
    fc_w_t = jax.random.normal(k_w, (E, Fdim), dtype=jnp.float32) * (1.0 / math.sqrt(E))
    fc_b = jax.random.normal(k_b, (Fdim,), dtype=jnp.float32) * 0.01

    out = mllt_forward(ot_h, label_h, fc_w_t, fc_b)
    out = jax.block_until_ready(out)

    ref = jax.block_until_ready(mllt_reference(ot_h, label_h, fc_w_t, fc_b))
    assert out.shape == (B, E)
    np.testing.assert_allclose(np.asarray(out), np.asarray(ref), rtol=1e-2, atol=1e-2)

    print("KERNEL_OK")
</pallas_src>

<mosaic_0001>
module attributes {stable_mosaic.version = 11 : i64} {
  func.func @_mllt_kernel(%arg0: i32, %arg1: memref<2x16x768xf32, #tpu.memory_space<vmem>>, %arg2: memref<768x8xbf16, #tpu.memory_space<vmem>>, %arg3: memref<1x8xf32, #tpu.memory_space<vmem>>, %arg4: memref<2x768xf32, #tpu.memory_space<vmem>>) attributes {dimension_semantics = [#tpu.dimension_semantics<parallel>], iteration_bounds = array<i64: 1>, scalar_prefetch = 0 : i64, scratch_operands = 0 : i64, tpu.core_type = #tpu.core_type<tc>, window_params = [{transform_indices = @transform_0, window_bounds = array<i64: 2, 16, 768>}, {pipeline_mode = #tpu.pipeline_mode<synchronous>, transform_indices = @transform_1, window_bounds = array<i64: 768, 8>}, {pipeline_mode = #tpu.pipeline_mode<synchronous>, transform_indices = @transform_2, window_bounds = array<i64: 1, 8>}, {transform_indices = @transform_3, window_bounds = array<i64: 2, 768>}]} {
    %c0 = arith.constant 0 : index
    %c0_0 = arith.constant 0 : index
    %c0_1 = arith.constant 0 : index
    %0 = vector.load %arg1[%c0, %c0_0, %c0_1] : memref<2x16x768xf32, #tpu.memory_space<vmem>>, vector<2x16x768xf32>
    %1 = vector.shape_cast %0 : vector<2x16x768xf32> to vector<32x768xf32>
    %2 = arith.truncf %1 : vector<32x768xf32> to vector<32x768xbf16>
    %c0_2 = arith.constant 0 : index
    %c0_3 = arith.constant 0 : index
    %3 = vector.load %arg2[%c0_2, %c0_3] : memref<768x8xbf16, #tpu.memory_space<vmem>>, vector<768x8xbf16>
    %cst = arith.constant dense<0.000000e+00> : vector<32x8xf32>
    %4 = tpu.matmul %2, %3, %cst {dimension_numbers = #tpu.dot_dimension_numbers<[1], [0], [0], [1], [0, 0, 1, 1], [], []>} : vector<32x768xbf16>, vector<768x8xbf16>, vector<32x8xf32> -> vector<32x8xf32>
    %c0_4 = arith.constant 0 : index
    %c0_5 = arith.constant 0 : index
    %5 = vector.load %arg3[%c0_4, %c0_5] : memref<1x8xf32, #tpu.memory_space<vmem>>, vector<1x8xf32>
    %6 = vector.broadcast %5 : vector<1x8xf32> to vector<32x8xf32>
    %7 = arith.addf %4, %6 : vector<32x8xf32>
    %cst_6 = arith.constant dense<0xFF800000> : vector<32xf32>
    %8 = vector.multi_reduction <maximumf>, %7, %cst_6 [1] : vector<32x8xf32> to vector<32xf32>
    %9 = vector.shape_cast %8 : vector<32xf32> to vector<32x1xf32>
    %10 = vector.shape_cast %9 : vector<32x1xf32> to vector<2x16x1xf32>
    %cst_7 = arith.constant dense<0xFF800000> : vector<2x1xf32>
    %11 = vector.multi_reduction <maximumf>, %10, %cst_7 [1] : vector<2x16x1xf32> to vector<2x1xf32>
    %12 = vector.shape_cast %11 : vector<2x1xf32> to vector<2x1x1xf32>
    %13 = vector.broadcast %12 : vector<2x1x1xf32> to vector<2x16x1xf32>
    %14 = arith.subf %10, %13 : vector<2x16x1xf32>
    %15 = math.exp %14 : vector<2x16x1xf32>
    %cst_8 = arith.constant dense<0.000000e+00> : vector<2x1xf32>
    %16 = vector.multi_reduction <add>, %15, %cst_8 [1] : vector<2x16x1xf32> to vector<2x1xf32>
    %17 = vector.shape_cast %16 : vector<2x1xf32> to vector<2x1x1xf32>
    %cst_9 = arith.constant 1.600000e+01 : f32
    %18 = vector.broadcast %cst_9 : f32 to vector<2x1x1xf32>
    %19 = arith.mulf %17, %18 : vector<2x1x1xf32>
    %20 = tpu.reciprocal %19 {approx = true} : vector<2x1x1xf32> -> vector<2x1x1xf32>
    %21 = vector.broadcast %20 : vector<2x1x1xf32> to vector<2x16x1xf32>
    %22 = arith.mulf %15, %21 : vector<2x16x1xf32>
    %23 = vector.broadcast %22 : vector<2x16x1xf32> to vector<2x16x768xf32>
    %24 = arith.mulf %0, %23 : vector<2x16x768xf32>
    %cst_10 = arith.constant dense<0.000000e+00> : vector<2x768xf32>
    %25 = vector.multi_reduction <add>, %24, %cst_10 [1] : vector<2x16x768xf32> to vector<2x768xf32>
    %c0_11 = arith.constant 0 : index
    %c0_12 = arith.constant 0 : index
    %26 = vector.load %arg4[%c0_11, %c0_12] : memref<2x768xf32, #tpu.memory_space<vmem>>, vector<2x768xf32>
    tpu.vector_store %arg4[%c0_11, %c0_12], %25 {strides = array<i32>} : memref<2x768xf32, #tpu.memory_space<vmem>>, vector<2x768xf32>,
    return
  }
  func.func @transform_0(%arg0: i32) -> (i32, i32, i32) {
    %c0_i32 = arith.constant 0 : i32
    %c0_i32_0 = arith.constant 0 : i32
    %c0_i32_1 = arith.constant 0 : i32
    return %arg0, %c0_i32, %c0_i32_0 : i32, i32, i32
  }
  func.func @transform_1(%arg0: i32) -> (i32, i32) {
    %c0_i32 = arith.constant 0 : i32
    %c0_i32_0 = arith.constant 0 : i32
    %c0_i32_1 = arith.constant 0 : i32
    return %c0_i32, %c0_i32_0 : i32, i32
  }
  func.func @transform_2(%arg0: i32) -> (i32, i32) {
    %c0_i32 = arith.constant 0 : i32
    %c0_i32_0 = arith.constant 0 : i32
    %c0_i32_1 = arith.constant 0 : i32
    return %c0_i32, %c0_i32_0 : i32, i32
  }
  func.func @transform_3(%arg0: i32) -> (i32, i32) {
    %c0_i32 = arith.constant 0 : i32
    %c0_i32_0 = arith.constant 0 : i32
    return %arg0, %c0_i32 : i32, i32
  }
}

</mosaic_0001>

<bundles_post_ra>
// kernel: tpu_custom_call.1
= control target key start
LH: loop header
LB: loop body
LE: loop exit
PB: predicated region body
PF: predicated region fallthrough
CT: control target
= control target key end

     0   :  { %s1446_s0 = inlined_call_operand.vmem [shape: f32[2,16,768], index: 0, kind: input, shape index: {}]   ;;  %s1447_s1 = inlined_call_operand.vmem [shape: bf16[768,8], index: 1, kind: input, shape index: {}]   ;;  %s1448_s2 = inlined_call_operand.vmem [shape: f32[1,8], index: 2, kind: input, shape index: {}]   ;;  %s1449_s3 = inlined_call_operand.hbm [shape: f32[2,768], index: 3, kind: output, shape index: {}]  }
   0x1   :  { %v1010_v0 = vld [vmem:[%s1447_s1 + $0x40] sm:$0xff]   ;;  %v1014_v4 = vld [vmem:[%s1447_s1 + $0x48] sm:$0xff]   ;;  %v1018_v8 = vld [vmem:[%s1447_s1 + $0x50] sm:$0xff]  }
   0x2   :  { %v1011_v1 = vld [vmem:[%s1447_s1 + $0xc0] sm:$0xff]   ;;  %908 = vmatprep.subr.bf16.mxu0 %v1010_v0  ;;  %v1015_v5 = vld [vmem:[%s1447_s1 + $0xc8] sm:$0xff]   ;;  %v1019_v9 = vld [vmem:[%s1447_s1 + $0xd0] sm:$0xff]  }
   0x3   :  { %v1012_v2 = vld [vmem:[%s1447_s1] sm:$0xff]   ;;  %936 = vmatprep.subr.bf16.mxu1 %v1011_v1  ;;  %v1016_v6 = vld [vmem:[%s1447_s1 + $0x8] sm:$0xff]   ;;  %v1020_v10 = vld [vmem:[%s1447_s1 + $0x10] sm:$0xff]  }
   0x4   :  { %v1013_v3 = vld [vmem:[%s1447_s1 + $0x80] sm:$0xff]   ;;  %909 = vmatpush3.bf16.msra.mxu0 %v1012_v2  ;;  %v1017_v7 = vld [vmem:[%s1447_s1 + $0x88] sm:$0xff]   ;;  %v1021_v11 = vld [vmem:[%s1447_s1 + $0x90] sm:$0xff]  }
   0x5   :  { %937 = vmatpush3.bf16.msra.mxu1 %v1013_v3  ;;  %910 = vmatprep.subr.bf16.mxu0 %v1014_v4  ;;  %v1022_v12 = vld [vmem:[%s1447_s1 + $0x58] sm:$0xff]   ;;  %v1026_v16 = vld [vmem:[%s1447_s1 + $0x60] sm:$0xff]   ;;  %v1030_v20 = vld [vmem:[%s1447_s1 + $0x68] sm:$0xff]  }
   0x6   :  { %938 = vmatprep.subr.bf16.mxu1 %v1015_v5  ;;  %v1023_v13 = vld [vmem:[%s1447_s1 + $0xd8] sm:$0xff]   ;;  %v1027_v17 = vld [vmem:[%s1447_s1 + $0xe0] sm:$0xff]   ;;  %v1031_v21 = vld [vmem:[%s1447_s1 + $0xe8] sm:$0xff]  }
   0x7   :  { %v1024_v14 = vld [vmem:[%s1447_s1 + $0x18] sm:$0xff]   ;;  %v1028_v18 = vld [vmem:[%s1447_s1 + $0x20] sm:$0xff]   ;;  %v1032_v22 = vld [vmem:[%s1447_s1 + $0x28] sm:$0xff]  }
   0x8   :  { %911 = vmatpush3.bf16.msra.mxu0 %v1016_v6  ;;  %v1025_v15 = vld [vmem:[%s1447_s1 + $0x98] sm:$0xff]   ;;  %v1029_v19 = vld [vmem:[%s1447_s1 + $0xa0] sm:$0xff]   ;;  %v1033_v23 = vld [vmem:[%s1447_s1 + $0xa8] sm:$0xff]  }
   0x9   :  { %939 = vmatpush3.bf16.msra.mxu1 %v1017_v7  ;;  %912 = vmatprep.subr.bf16.mxu0 %v1018_v8  ;;  %v1034_v24 = vld [vmem:[%s1447_s1 + $0x70] sm:$0xff]   ;;  %v1038_v28 = vld [vmem:[%s1447_s1 + $0x78] sm:$0xff]   ;;  %v1215_v32 = vld [vmem:[%s1446_s0 + $0x8] sm:$0xff] }
   0xa   :  { %940 = vmatprep.subr.bf16.mxu1 %v1019_v9  ;;  %v1035_v25 = vld [vmem:[%s1447_s1 + $0xf0] sm:$0xff]   ;;  %v1039_v29 = vld [vmem:[%s1447_s1 + $0xf8] sm:$0xff]   ;;  %v1232_v36 = vld [vmem:[%s1446_s0 + $0x48] sm:$0xff] }
   0xb   :  { %v1036_v26 = vld [vmem:[%s1447_s1 + $0x30] sm:$0xff]   ;;  %v1040_v30 = vld [vmem:[%s1447_s1 + $0x38] sm:$0xff]   ;;  %v1237_v37 = vld [vmem:[%s1446_s0] sm:$0xff] }
   0xc   :  { %913 = vmatpush3.bf16.msra.mxu0 %v1020_v10  ;;  %v1037_v27 = vld [vmem:[%s1447_s1 + $0xb0] sm:$0xff]   ;;  %v1041_v31 = vld [vmem:[%s1447_s1 + $0xb8] sm:$0xff]   ;;  %v1256_v42 = vld [vmem:[%s1446_s0 + $0x40] sm:$0xff] }
   0xd   :  { %941 = vmatpush3.bf16.msra.mxu1 %v1021_v11  ;;  %914 = vmatprep.subr.bf16.mxu0 %v1022_v12  ;;  %v1220_v33 = vld [vmem:[%s1446_s0 + $0x38] sm:$0xff]  ;;  %v1242_v38 = vld [vmem:[%s1446_s0 + $0x30] sm:$0xff]  ;;  %v1042_v44 = vld [vmem:[%s1447_s1 + $0x140] sm:$0xff]  }
   0xe   :  { %942 = vmatprep.subr.bf16.mxu1 %v1023_v13  ;;  %v1225_v34 = vld [vmem:[%s1446_s0 + $0x18] sm:$0xff]  ;;  %v41_v35 = vpack.c.bf16 %v1220_v33, %v1215_v32  ;;  %v40_v40 = vpack.c.bf16 %v1242_v38, %v1237_v37  ;;  %v1251_v41 = vld [vmem:[%s1446_s0 + $0x10] sm:$0xff]  ;;  %v1043_v45 = vld [vmem:[%s1447_s1 + $0x100] sm:$0xff]  }
   0xf   :  { %v43_v39 = vpack.c.bf16 %v1232_v36, %v1225_v34  ;;  %v42_v43 = vpack.c.bf16 %v1256_v42, %v1251_v41  ;;  %v1044_v46 = vld [vmem:[%s1447_s1 + $0x148] sm:$0xff]   ;;  %v1046_v48 = vld [vmem:[%s1447_s1 + $0x150] sm:$0xff]   ;;  %v1048_v50 = vld [vmem:[%s1447_s1 + $0x158] sm:$0xff]  }
  0x10   :  { %915 = vmatpush3.bf16.msra.mxu0 %v1024_v14  ;;  %475 = vmatprep.mubr.bf16.mxu0 %v41_v35  ;;  %v1045_v47 = vld [vmem:[%s1447_s1 + $0x108] sm:$0xff]   ;;  %v1047_v49 = vld [vmem:[%s1447_s1 + $0x110] sm:$0xff]   ;;  %v1049_v51 = vld [vmem:[%s1447_s1 + $0x118] sm:$0xff]  }
  0x11   :  { %943 = vmatpush3.bf16.msra.mxu1 %v1025_v15  ;;  %916 = vmatprep.subr.bf16.mxu0 %v1026_v16  ;;  %v1287_v52 = vld [vmem:[%s1446_s0 + $0x68] sm:$0xff]  ;;  %v1292_v53 = vld [vmem:[%s1446_s0 + $0x98] sm:$0xff]  ;;  %v1297_v54 = vld [vmem:[%s1446_s0 + $0x60] sm:$0xff] }
  0x12   :  { %944 = vmatprep.subr.bf16.mxu1 %v1027_v17  ;;  %524 = vmatprep.mubr.bf16.mxu1 %v43_v39  ;;  %v1302_v55 = vld [vmem:[%s1446_s0 + $0x90] sm:$0xff]  ;;  %v47_v56 = vpack.c.bf16 %v1292_v53, %v1287_v52  ;;  %v1311_v58 = vld [vmem:[%s1446_s0 + $0x78] sm:$0xff]  ;;  %v1316_v59 = vld [vmem:[%s1446_s0 + $0xa8] sm:$0xff] }
  0x13   :  { %v46_v57 = vpack.c.bf16 %v1302_v55, %v1297_v54  ;;  %v1050_v60 = vld [vmem:[%s1447_s1 + $0x160] sm:$0xff]   ;;  %v49_v61 = vpack.c.bf16 %v1316_v59, %v1311_v58  ;;  %v1326_v62 = vld [vmem:[%s1446_s0 + $0x70] sm:$0xff]  ;;  %v1052_v2 = vld [vmem:[%s1447_s1 + $0x168] sm:$0xff]  }
  0x14   :  { %917 = vmatpush3.bf16.msra.mxu0 %v1028_v18  ;;  %v1331_v63 = vld [vmem:[%s1446_s0 + $0xa0] sm:$0xff]  ;;  %v1344_v3 = vld [vmem:[%s1446_s0 + $0x28] sm:$0xff]  ;;  %v1349_v4 = vld [vmem:[%s1446_s0 + $0x58] sm:$0xff] }
  0x15   :  { %945 = vmatpush3.bf16.msra.mxu1 %v1029_v19  ;;  %918 = vmatprep.subr.bf16.mxu0 %v1030_v20  ;;  %v48_v0 = vpack.c.bf16 %v1331_v63, %v1326_v62  ;;  %v1051_v1 = vld [vmem:[%s1447_s1 + $0x120] sm:$0xff]   ;;  %v1053_v5 = vld [vmem:[%s1447_s1 + $0x128] sm:$0xff]   ;;  %v45_v6 = vpack.c.bf16 %v1349_v4, %v1344_v3  ;;  %v1364_v8 = vld [vmem:[%s1446_s0 + $0xb8] sm:$0xff] }
  0x16   :  { %946 = vmatprep.subr.bf16.mxu1 %v1031_v21  ;;  %v1359_v7 = vld [vmem:[%s1446_s0 + $0x88] sm:$0xff]  ;;  %v1054_v9 = vld [vmem:[%s1447_s1 + $0x170] sm:$0xff]  }
  0x17   :  { %v51_v10 = vpack.c.bf16 %v1364_v8, %v1359_v7 }
  0x18   :  { %919 = vmatpush3.bf16.msra.mxu0 %v1032_v22 }
  0x19   :  { %947 = vmatpush3.bf16.msra.mxu1 %v1033_v23  ;;  %920 = vmatprep.subr.bf16.mxu0 %v1034_v24 }
  0x1a   :  { %948 = vmatprep.subr.bf16.mxu1 %v1035_v25 }
  0x1c   :  { %921 = vmatpush3.bf16.msra.mxu0 %v1036_v26 }
  0x1d   :  { %949 = vmatpush3.bf16.msra.mxu1 %v1037_v27  ;;  %922 = vmatprep.subr.bf16.mxu0 %v1038_v28 }
  0x1e   :  { %950 = vmatprep.subr.bf16.mxu1 %v1039_v29 }
  0x20   :  { %923 = vmatpush3.bf16.msra.mxu0 %v1040_v30 }
  0x21   :  { %951 = vmatpush3.bf16.msra.mxu1 %v1041_v31  ;;  %964 = vmatprep.subr.bf16.mxu0 %v1042_v44 }
  0x22   :  { %992 = vmatprep.subr.bf16.mxu1 %v1042_v44 }
  0x23   :  { %476 = vmatmul.mubr.bf16.vlgmr.msra.gmra.mrb[0].mxu0 %v40_v40 }
  0x24   :  { %525 = vmatmul.mubr.bf16.vlgmr.msra.gmra.mrb[0].mxu1 %v42_v43  ;;  %965 = vmatpush3.bf16.msra.mxu0 %v1043_v45 }
  0x25   :  { %1000 = vmatpush3.bf16.msra.mxu1 %v1043_v45  ;;  %966 = vmatprep.subr.bf16.mxu0 %v1044_v46 }
  0x26   :  { %993 = vmatprep.subr.bf16.mxu1 %v1044_v46  ;;  %483 = vmatprep.mubr.bf16.mxu0 %v47_v56 }
  0x27   :  { %532 = vmatprep.mubr.bf16.mxu1 %v49_v61 }
  0x28   :  { %967 = vmatpush3.bf16.msra.mxu0 %v1045_v47 }
  0x29   :  { %1001 = vmatpush3.bf16.msra.mxu1 %v1045_v47  ;;  %968 = vmatprep.subr.bf16.mxu0 %v1046_v48 }
  0x2a   :  { %994 = vmatprep.subr.bf16.mxu1 %v1046_v48 }
  0x2b   :  { %484 = vmatmul.mubr.bf16.gmra.mrb[4].mxu0 %v46_v57 }
  0x2c   :  { %969 = vmatpush3.bf16.msra.mxu0 %v1047_v49  ;;  %533 = vmatmul.mubr.bf16.gmra.mrb[4].mxu1 %v48_v0 }
  0x2d   :  { %1002 = vmatpush3.bf16.msra.mxu1 %v1047_v49  ;;  %970 = vmatprep.subr.bf16.mxu0 %v1048_v50 }
  0x2e   :  { %995 = vmatprep.subr.bf16.mxu1 %v1048_v50  ;;  %573 = vmatprep.mubr.bf16.mxu0 %v45_v6 }
  0x30   :  { %971 = vmatpush3.bf16.msra.mxu0 %v1049_v51 }
  0x31   :  { %1003 = vmatpush3.bf16.msra.mxu1 %v1049_v51  ;;  %972 = vmatprep.subr.bf16.mxu0 %v1050_v60 }
  0x32   :  { %996 = vmatprep.subr.bf16.mxu1 %v1050_v60 }
  0x34   :  { %973 = vmatpush3.bf16.msra.mxu0 %v1051_v1 }
  0x35   :  { %1004 = vmatpush3.bf16.msra.mxu1 %v1051_v1  ;;  %974 = vmatprep.subr.bf16.mxu0 %v1052_v2 }
  0x36   :  { %997 = vmatprep.subr.bf16.mxu1 %v1052_v2 }
  0x37   :  { %8 = vsyncpa [#allocation3], 0  ;;  %581 = vmatprep.mubr.bf16.mxu1 %v51_v10  ;;  %v1055_v11 = vld [vmem:[%s1447_s1 + $0x130] sm:$0xff]   ;;  %v1056_v12 = vld [vmem:[%s1447_s1 + $0x178] sm:$0xff]   ;;  %vm590_vm0 = vcmask 64512   ;;  %vm826_vm1 = vcmask 1041409  }
  0x38   :  { %975 = vmatpush3.bf16.msra.mxu0 %v1053_v5  ;;  %v1057_v13 = vld [vmem:[%s1447_s1 + $0x138] sm:$0xff]   ;;  %v1383_v14 = vld [vmem:[%s1446_s0 + $0x20] sm:$0xff]  ;;  %v1388_v15 = vld [vmem:[%s1446_s0 + $0x50] sm:$0xff]  ;;  %vm828_vm2 = vcmask 1043459   ;;  %vm830_vm3 = vcmask 1045509   ;;  %vm832_vm4 = vcmask 1047559  }
  0x39   :  { %1005 = vmatpush3.bf16.msra.mxu1 %v1053_v5  ;;  %976 = vmatprep.subr.bf16.mxu0 %v1054_v9  ;;  %v1393_v16 = vld [vmem:[%s1446_s0 + $0x80] sm:$0xff]  ;;  %v1398_v17 = vld [vmem:[%s1446_s0 + $0xb0] sm:$0xff]  ;;  %v44_v18 = vpack.c.bf16 %v1388_v15, %v1383_v14  ;;  %s1095_s0 = smov [#allocation2]  }
  0x3a   :  { %998 = vmatprep.subr.bf16.mxu1 %v1054_v9  ;;  %v50_v19 = vpack.c.bf16 %v1398_v17, %v1393_v16  ;;  %v859_v22 = vld [vmem:[%s1448_s2] ss:$0 sm:$0xff]  ;;  %s851_s2 = sshll.u32 %s1095_s0, 4  ;;  %s852_s2 = int_to_ptr.vmem [resolvable:$true] %s851_s2 }
  0x3b   :  { %s1070_s22 = scalar_lea.vmem %s852_s2, 192  ;;  %p1075_p1 = scmp.lt.s32.totalorder %s852_s2, %s852_s2 }
  0x3c   :  { %977 = vmatpush3.bf16.msra.mxu0 %v1055_v11  ;;  %p1071_p0 = scmp.ne.s32.totalorder %s852_s2, %s1070_s22  ;;  %p1076_p2 = scmp.lt.s32.totalorder %s1070_s22, %s1070_s22 }
  0x3d   :  { %1006 = vmatpush3.bf16.msra.mxu1 %v1055_v11  ;;  %978 = vmatprep.subr.bf16.mxu0 %v1056_v12 }
  0x3e   :  { %999 = vmatprep.subr.bf16.mxu1 %v1056_v12  ;;  %p1077_p3 = por %p1076_p2, %p1075_p1 }
  0x40   :  { %979 = vmatpush3.bf16.msra.mxu0 %v1057_v13  ;;  %p1078_p4 = pnand %p1077_p3, %p1071_p0 }
  0x41   :  { %1007 = vmatpush3.bf16.msra.mxu1 %v1057_v13 }
  0x43   :  { %574 = vmatmul.mubr.bf16.vlgmr.msra.gmra.mrb[8].mxu0 %v44_v18 }
  0x44   :  { %582 = vmatmul.mubr.bf16.vlgmr.msra.gmra.mrb[8].mxu1 %v50_v19 }
  0xf6   :  { %v924_v20 = vpop.f32.mrb[0].mxu0 }
  0xf7   :  { %v952_v21 = vpop.f32.mrb[0].mxu1  ;;  %v925_v23 = vpop.f32.mrb[1].mxu0 }
  0xf8   :  { %v926_v24 = vadd.f32 %v925_v23, %v924_v20  ;;  %v953_v25 = vpop.f32.mrb[1].mxu1  ;;  %v927_v26 = vpop.f32.mrb[2].mxu0 }
  0xf9   :  { %v954_v27 = vadd.f32 %v953_v25, %v952_v21  ;;  %v955_v28 = vpop.f32.mrb[2].mxu1  ;;  %v928_v29 = vpop.f32.mrb[3].mxu0 }
  0xfa   :  { %v478_v30 = vadd.f32 %v926_v24, %v859_v22  ;;  %v929_v31 = vadd.f32 %v928_v29, %v927_v26  ;;  %v956_v35 = vpop.f32.mrb[3].mxu1 }
  0xfb   :  { %v957_v39 = vadd.f32 %v956_v35, %v955_v28 }
  0xfc   :  { %v527_v40 = vadd.f32 %v954_v27, %v478_v30  ;;  %v481_v43 = vadd.f32 %v929_v31, %v859_v22 }
  0xfe   :  { %v530_v44 = vadd.f32 %v957_v39, %v481_v43  ;;  %v930_v45 = vpop.f32.mrb[4].mxu0 }
  0xff   :  { %v931_v46 = vpop.f32.mrb[5].mxu0  ;;  %v958_v49 = vpop.f32.mrb[4].mxu1 }
 0x100   :  { %v932_v47 = vadd.f32 %v931_v46, %v930_v45  ;;  %v933_v48 = vpop.f32.mrb[6].mxu0  ;;  %v959_v57 = vpop.f32.mrb[5].mxu1 }
 0x101   :  { %v934_v50 = vpop.f32.mrb[7].mxu0  ;;  %v960_v60 = vadd.f32 %v959_v57, %v958_v49  ;;  %v961_v61 = vpop.f32.mrb[6].mxu1 }
 0x102   :  { %v486_v51 = vadd.f32 %v932_v47, %v859_v22  ;;  %v935_v56 = vadd.f32 %v934_v50, %v933_v48  ;;  %v962_v1 = vpop.f32.mrb[7].mxu1 }
 0x103   :  { %v963_v5 = vadd.f32 %v962_v1, %v961_v61 }
 0x104   :  { %v489_v0 = vadd.f32 %v935_v56, %v859_v22  ;;  %v535_v2 = vadd.f32 %v960_v60, %v486_v51 }
 0x106   :  { %v538_v6 = vadd.f32 %v963_v5, %v489_v0 }
 0x116   :  { %v980_v9 = vpop.f32.mrb[8].mxu0 }
 0x117   :  { %v986_v10 = vpop.f32.mrb[8].mxu1  ;;  %v981_v11 = vpop.f32.mrb[9].mxu0 }
 0x118   :  { %v982_v12 = vadd.f32 %v981_v11, %v980_v9  ;;  %v987_v13 = vpop.f32.mrb[9].mxu1  ;;  %v983_v18 = vpop.f32.mrb[10].mxu0 }
 0x119   :  { %v988_v19 = vadd.f32 %v987_v13, %v986_v10  ;;  %v989_v20 = vpop.f32.mrb[10].mxu1  ;;  %v984_v21 = vpop.f32.mrb[11].mxu0 }
 0x11a   :  { %v985_v23 = vadd.f32 %v984_v21, %v983_v18  ;;  %v990_v24 = vpop.f32.mrb[11].mxu1  ;;  %v576_v25 = vadd.f32 %v982_v12, %v527_v40 }
 0x11b   :  { %v991_v26 = vadd.f32 %v990_v24, %v989_v20  ;;  %v584_v27 = vadd.f32 %v988_v19, %v535_v2 }
 0x11c   :  { %v591_v22 = vsel %vm590_vm0, %v576_v25, -inf  ;;  %v579_v28 = vadd.f32 %v985_v23, %v530_v44 }
 0x11d   :  { %v597_v29 = vsel %vm590_vm0, %v584_v27, -inf  ;;  %592 = vmax.xlane.f32.xlu1 %v591_v22  ;;  %v587_v30 = vadd.f32 %v991_v26, %v538_v6 }
 0x11e   :  { %598 = vmax.xlane.f32.xlu0 %v597_v29  ;;  %v594_v31 = vsel %vm590_vm0, %v579_v28, -inf }
 0x11f   :  { %v600_v35 = vsel %vm590_vm0, %v587_v30, -inf }
 0x121   :  { %595 = vmax.xlane.f32.xlu1 %v594_v31 }
 0x122   :  { %601 = vmax.xlane.f32.xlu0 %v600_v35 }
 0x1aa   :  { %v593_v39 = vpop.xlane.xlu1 %592 }
 0x1ab   :  { %v599_v43 = vpop.xlane.xlu0 %598 }
 0x1ae   :  { %v596_v45 = vpop.xlane.xlu1 %595 }
 0x1af   :  { %v602_v46 = vpop.xlane.xlu0 %601  ;;  %v603_v47 = vmax.f32 %v593_v39, %v596_v45 }
 0x1b0   :  { %v610_v48 = vmax.f32 %v599_v43, %v602_v46 }
 0x1b1   :  { %v604_v49 = vrot.slane %v603_v47, 4 }
 0x1b2   :  { %v611_v40 = vrot.slane %v610_v48, 4 }
 0x1b3   :  { %v605_v50 = vmax.f32 %v603_v47, %v604_v49 }
 0x1b4   :  { %v612_v51 = vmax.f32 %v610_v48, %v611_v40 }
 0x1b5   :  { %v606_v56 = vrot.slane %v605_v50, 2 }
 0x1b6   :  { %v613_v44 = vrot.slane %v612_v51, 2 }
 0x1b7   :  { %v607_v57 = vmax.f32 %v605_v50, %v606_v56 }
 0x1b8   :  { %v614_v60 = vmax.f32 %v612_v51, %v613_v44 }
 0x1b9   :  { %v608_v61 = vrot.slane %v607_v57, 1 }
 0x1ba   :  { %v615_v0 = vrot.slane %v614_v60, 1 }
 0x1bb   :  { %v609_v1 = vmax.f32 %v607_v57, %v608_v61 }
 0x1bc   :  { %v616_v2 = vmax.f32 %v614_v60, %v615_v0 }
 0x1bd   :  { %v617_v5 = vsub.f32 %v593_v39, %v609_v1  ;;  %v618_v6 = vsub.f32 %v596_v45, %v609_v1 }
 0x1be   :  { %v619_v9 = vsub.f32 %v599_v43, %v616_v2  ;;  %v620_v10 = vsub.f32 %v602_v46, %v616_v2 }
 0x1bf   :  { %v621_v11 = vmul.f32 1.442695, %v617_v5  ;;  %v623_v18 = vmul.f32 1.442695, %v618_v6 }
 0x1c0   :  { %v625_v12 = vmul.f32 1.442695, %v619_v9  ;;  %v627_v13 = vmul.f32 1.442695, %v620_v10 }
 0x1c1   :  { %1058 = vpow2.f32 %v621_v11 }
 0x1c2   :  { %1060 = vpow2.f32 %v625_v12 }
 0x1c3   :  { %1062 = vpow2.f32 %v627_v13 }
 0x1c4   :  { %1064 = vpow2.f32 %v623_v18 }
 0x1cb   :  { %v1059_v19 = vpop.eup %1058 }
 0x1cc   :  { %v1061_v20 = vpop.eup %1060 }
 0x1cd   :  { %v1063_v21 = vpop.eup %1062 }
 0x1ce   :  { %v1065_v23 = vpop.eup %1064  ;;  %v636_v24 = vadd.f32 %v1063_v21, %v1061_v20 }
 0x1cf   :  { %v629_v25 = vadd.f32 %v1065_v23, %v1059_v19 }
 0x1d0   :  { %v637_v26 = vrot.slane %v636_v24, 4 }
 0x1d1   :  { %v630_v27 = vrot.slane %v629_v25, 4 }
 0x1d2   :  { %v638_v22 = vadd.f32 %v637_v26, %v636_v24 }
 0x1d3   :  { %v631_v28 = vadd.f32 %v630_v27, %v629_v25 }
 0x1d4   :  { %v639_v29 = vrot.slane %v638_v22, 2 }
 0x1d5   :  { %v632_v30 = vrot.slane %v631_v28, 2 }
 0x1d6   :  { %v640_v31 = vadd.f32 %v639_v29, %v638_v22  ;;  %v1094_v22 = vmov 1983009808   ;;  %v776_v29 = vlaneseq }
 0x1d7   :  { %v633_v35 = vadd.f32 %v632_v30, %v631_v28  ;;  %v1423_v28 = vunpack.c.l.s4 %v1094_v22 }
 0x1d8   :  { %v641_v39 = vrot.slane %v640_v31, 1 }
 0x1d9   :  { %v634_v43 = vrot.slane %v633_v35, 1 }
 0x1da   :  { %v642_v45 = vadd.f32 %v641_v39, %v640_v31 }
 0x1db   :  { %v635_v46 = vadd.f32 %v634_v43, %v633_v35 }
 0x1dc   :  { %v644_v47 = vmul.f32 16.0, %v642_v45 }
 0x1dd   :  { %v643_v48 = vmul.f32 16.0, %v635_v46 }
 0x1de   :  { %1066 = vrcp.f32 %v644_v47 }
 0x1df   :  { %1068 = vrcp.f32 %v643_v48 }
 0x1e8   :  { %v1067_v49 = vpop.eup %1066 }
 0x1e9   :  { %v1069_v40 = vpop.eup %1068  ;;  %v649_v50 = vmul.f32 %v1067_v49, %v1061_v20  ;;  %v650_v44 = vmul.f32 %v1067_v49, %v1063_v21 }
 0x1ea   :  { %v647_v51 = vmul.f32 %v1069_v40, %v1059_v19  ;;  %v648_v56 = vmul.f32 %v1069_v40, %v1065_v23 }
 0x1eb   :  { %v663_v57 = vmul.f32 %v649_v50, %v1297_v54  ;;  %v664_v60 = vmul.f32 %v649_v50, %v1287_v52  ;;  %v665_v43 = vmul.f32 %v649_v50, %v1326_v62  ;;  %v666_v45 = vmul.f32 %v649_v50, %v1311_v58 }
 0x1ec   :  { %v651_v61 = vmul.f32 %v647_v51, %v1237_v37  ;;  %v652_v0 = vmul.f32 %v647_v51, %v1215_v32  ;;  %v653_v1 = vmul.f32 %v647_v51, %v1251_v41  ;;  %v654_v2 = vmul.f32 %v647_v51, %v1225_v34 }
 0x1ed   :  { %v655_v5 = vmul.f32 %v647_v51, %v1383_v14  ;;  %v656_v6 = vmul.f32 %v647_v51, %v1344_v3  ;;  %v657_v9 = vmul.f32 %v648_v56, %v1242_v38  ;;  %v658_v10 = vmul.f32 %v648_v56, %v1220_v33 }
 0x1ee   :  { %v659_v54 = vmul.f32 %v648_v56, %v1256_v42  ;;  %v660_v52 = vmul.f32 %v648_v56, %v1232_v36  ;;  %v661_v37 = vmul.f32 %v648_v56, %v1388_v15  ;;  %v662_v32 = vmul.f32 %v648_v56, %v1349_v4 }
 0x1ef   :  { %v669_v41 = vmul.f32 %v650_v44, %v1302_v55  ;;  %v670_v34 = vmul.f32 %v650_v44, %v1292_v53  ;;  %v675_v11 = vadd.f32 %v657_v9, %v651_v61  ;;  %v682_v14 = vadd.f32 %v658_v10, %v652_v0 }
 0x1f0   :  { %v689_v12 = vadd.f32 %v659_v54, %v653_v1  ;;  %v696_v3 = vadd.f32 %v660_v52, %v654_v2  ;;  %v703_v13 = vadd.f32 %v661_v37, %v655_v5  ;;  %v710_v38 = vadd.f32 %v662_v32, %v656_v6 }
 0x1f1   :  { %v717_v18 = vadd.f32 %v669_v41, %v663_v57  ;;  %v724_v33 = vadd.f32 %v670_v34, %v664_v60  ;;  %v676_v19 = vrot.slane %v675_v11, 4  ;;  %v683_v42 = vrot.slane %v682_v14, 4 }
 0x1f2   :  { %v690_v20 = vrot.slane %v689_v12, 4  ;;  %v697_v36 = vrot.slane %v696_v3, 4  ;;  %v704_v21 = vrot.slane %v703_v13, 4  ;;  %v711_v15 = vrot.slane %v710_v38, 4 }
 0x1f3   :  { %v718_v23 = vrot.slane %v717_v18, 4  ;;  %v725_v4 = vrot.slane %v724_v33, 4  ;;  %v677_v24 = vadd.f32 %v676_v19, %v675_v11  ;;  %v684_v55 = vadd.f32 %v683_v42, %v682_v14 }
 0x1f4   :  { %v691_v25 = vadd.f32 %v690_v20, %v689_v12  ;;  %v698_v53 = vadd.f32 %v697_v36, %v696_v3  ;;  %v705_v30 = vadd.f32 %v704_v21, %v703_v13  ;;  %v712_v31 = vadd.f32 %v711_v15, %v710_v38 }
 0x1f5   :  { %v719_v26 = vadd.f32 %v718_v23, %v717_v18  ;;  %v726_v27 = vadd.f32 %v725_v4, %v724_v33  ;;  %v667_v46 = vmul.f32 %v649_v50, %v1393_v16  ;;  %v668_v47 = vmul.f32 %v649_v50, %v1359_v7 }
 0x1f6   :  { %v678_v48 = vrot.slane %v677_v24, 2  ;;  %v685_v49 = vrot.slane %v684_v55, 2  ;;  %v692_v40 = vrot.slane %v691_v25, 2  ;;  %v699_v51 = vrot.slane %v698_v53, 2 }
 0x1f7   :  { %v720_v35 = vrot.slane %v719_v26, 2  ;;  %v727_v39 = vrot.slane %v726_v27, 2  ;;  %v671_v56 = vmul.f32 %v650_v44, %v1331_v63  ;;  %v672_v57 = vmul.f32 %v650_v44, %v1316_v59 }
 0x1f8   :  { %v673_v60 = vmul.f32 %v650_v44, %v1398_v17  ;;  %v674_v61 = vmul.f32 %v650_v44, %v1364_v8  ;;  %v706_v0 = vrot.slane %v705_v30, 2  ;;  %v713_v62 = vrot.slane %v712_v31, 2 }
 0x1f9   :  { %v721_v1 = vadd.f32 %v720_v35, %v719_v26  ;;  %v728_v58 = vadd.f32 %v727_v39, %v726_v27  ;;  %v775_v16 = vunpack.c.0.s8 %v1423_v28  ;;  %v777_v2 = vshrl.u32 %v776_v29, 7 }
 0x1fa   :  { %v679_v7 = vadd.f32 %v678_v48, %v677_v24  ;;  %v686_v50 = vadd.f32 %v685_v49, %v684_v55  ;;  %v693_v5 = vadd.f32 %v692_v40, %v691_v25  ;;  %v700_v6 = vadd.f32 %v699_v51, %v698_v53 }
 0x1fb   :  { %v731_v9 = vadd.f32 %v671_v56, %v665_v43  ;;  %v738_v10 = vadd.f32 %v672_v57, %v666_v45  ;;  %v745_v63 = vadd.f32 %v673_v60, %v667_v46  ;;  %v752_v54 = vadd.f32 %v674_v61, %v668_v47 }
 0x1fc   :  { %v707_v59 = vadd.f32 %v706_v0, %v705_v30  ;;  %v714_v52 = vadd.f32 %v713_v62, %v712_v31  ;;  %v722_v17 = vrot.slane %v721_v1, 1  ;;  %v729_v37 = vrot.slane %v728_v58, 1 }
 0x1fd   :  { %v732_v8 = vrot.slane %v731_v9, 4  ;;  %v739_v44 = vrot.slane %v738_v10, 4  ;;  %v746_v32 = vrot.slane %v745_v63, 4  ;;  %v753_v41 = vrot.slane %v752_v54, 4 }
 0x1fe   :  { %v680_v34 = vrot.slane %v679_v7, 1  ;;  %v687_v11 = vrot.slane %v686_v50, 1  ;;  %v694_v14 = vrot.slane %v693_v5, 1  ;;  %v701_v12 = vrot.slane %v700_v6, 1 }
 0x1ff   :  { %v733_v3 = vadd.f32 %v732_v8, %v731_v9  ;;  %v740_v13 = vadd.f32 %v739_v44, %v738_v10  ;;  %v747_v38 = vadd.f32 %v746_v32, %v745_v63  ;;  %v754_v18 = vadd.f32 %v753_v41, %v752_v54 }
 0x200   :  { %v708_v33 = vrot.slane %v707_v59, 1  ;;  %v715_v19 = vrot.slane %v714_v52, 1  ;;  %v723_v42 = vadd.f32 %v722_v17, %v721_v1  ;;  %v730_v20 = vadd.f32 %v729_v37, %v728_v58 }
 0x201   :  { %v734_v36 = vrot.slane %v733_v3, 2  ;;  %v741_v21 = vrot.slane %v740_v13, 2  ;;  %v748_v15 = vrot.slane %v747_v38, 2  ;;  %v755_v23 = vrot.slane %v754_v18, 2 }
 0x202   :  { %v681_v4 = vadd.f32 %v680_v34, %v679_v7  ;;  %v688_v24 = vadd.f32 %v687_v11, %v686_v50  ;;  %v695_v55 = vadd.f32 %v694_v14, %v693_v5  ;;  %v702_v25 = vadd.f32 %v701_v12, %v700_v6 }
 0x203   :  { %v735_v53 = vadd.f32 %v734_v36, %v733_v3  ;;  %v742_v26 = vadd.f32 %v741_v21, %v740_v13  ;;  %v749_v27 = vadd.f32 %v748_v15, %v747_v38  ;;  %v756_v22 = vadd.f32 %v755_v23, %v754_v18 }
 0x204   :  { %v709_v28 = vadd.f32 %v708_v33, %v707_v59  ;;  %v716_v29 = vadd.f32 %v715_v19, %v714_v52  ;;  %v778_v30 = vsub.s32 %v775_v16, %v777_v2  ;;  %v796_v31 = vcombine.low %v723_v42, %v730_v20 }
 0x205   :  { %v736_v35 = vrot.slane %v735_v53, 1  ;;  %v743_v39 = vrot.slane %v742_v26, 1  ;;  %v750_v43 = vrot.slane %v749_v27, 1  ;;  %v757_v45 = vrot.slane %v756_v22, 1 }
 0x206   :  { %v771_v46 = vcombine.low %v681_v4, %v688_v24  ;;  %v772_v47 = vcombine.low %v695_v55, %v702_v25  ;;  %v788_v56 = vcombine.low %v709_v28, %v716_v29  ;;  %v804_v60 = vrot.slane %v796_v31, %v778_v30 }
 0x207   :  { %v737_v48 = vadd.f32 %v736_v35, %v735_v53  ;;  %v744_v49 = vadd.f32 %v743_v39, %v742_v26  ;;  %v751_v40 = vadd.f32 %v750_v43, %v749_v27  ;;  %v758_v51 = vadd.f32 %v757_v45, %v756_v22 }
 0x208   :  { %v779_v0 = vrot.slane %v771_v46, %v778_v30  ;;  %v786_v62 = vrot.slane %v772_v47, %v778_v30  ;;  %v795_v16 = vrot.slane %v788_v56, %v778_v30 }
 0x209   :  { %v797_v57 = vcombine.low %v737_v48, %v744_v49  ;;  %v813_v61 = vcombine.low %v751_v40, %v758_v51 }
 0x20a   :  { %v787_v50 = vcombine.low %v779_v0, %v786_v62 }
 0x20b   :  { %v811_v1 = vrot.slane %v797_v57, %v778_v30  ;;  %v820_v58 = vrot.slane %v813_v61, %v778_v30 }
 0x20d   :  { %v812_v2 = vcombine.low %v804_v60, %v811_v1  ;;  %v836_v7 = vrot.slane %v820_v58, 7 }
 0x20f   :  { %v825_v5 = vrot.slane %v812_v2, 7  ;;  %v837_v6 = vsel %vm826_vm1, %v836_v7, %v795_v16 }
 0x210   :  { %v838_v9 = vsel %vm828_vm2, %v836_v7, %v837_v6 }
 0x211   :  { %v827_v10 = vsel %vm826_vm1, %v825_v5, %v787_v50  ;;  %v839_v63 = vsel %vm830_vm3, %v836_v7, %v838_v9 }
 0x212   :  { %v829_v54 = vsel %vm828_vm2, %v825_v5, %v827_v10  ;;  %v840_v59 = vsel %vm832_vm4, %v836_v7, %v839_v63 }
 0x213   :  { %v831_v52 = vsel %vm830_vm3, %v825_v5, %v829_v54  ;;  %844 = vst [vmem:[#allocation2 + $0x8] sm:$0xf] %v840_v59 }
 0x214   :  { %v833_v17 = vsel %vm832_vm4, %v825_v5, %v831_v52 }
 0x215   :  { %843 = vst [vmem:[#allocation2] sm:$0xff] %v833_v17 }
 0x216   :  { %1081 = shalt.err (!%p1078_p4)
}
 0x217   :  { %s1082_s25 = scalar_lea.hbm %s1449_s3, 192 }
 0x218   :  { %p1083_p5 = scmp.ne.s32.totalorder %s1449_s3, %s1082_s25  ;;  %p1086_p6 = scmp.lt.u32.totalorder %s1082_s25, %s1449_s3 }
 0x21a   :  { %p1088_p7 = pnand %p1086_p6, %p1083_p5 }
 0x21c   :  { %1091 = shalt.err (!%p1088_p7)
}
 0x21d   :  { %854 = dma.vmem_to_hbm [thread:$0]  %s852_s2, 192, %s1449_s3, [#allocation3]  }
 0x21e   :  { %1092 = dma.done.wait [#allocation3], 192  }
 0x21f   :  { %1093 = vsyncadd [#allocation3], 4294967104 }
 0x220   :  { %858 = vsyncpa [#allocation3], 1 }

</bundles_post_ra>
